<compile_context>
chip_gen: v5e
topology: v5e:2x2
jax: 0.10.0
libtpu: 0.0.40
codegen_flags: <defaults>
</compile_context>

<pallas_src>
import functools

import jax
import jax.numpy as jnp
from jax import lax
from jax.experimental import pallas as pl
from jax.experimental.pallas import tpu as pltpu


def _round_up(x, m):
    return ((x + m - 1) // m) * m


def _vmem_capacity_bytes():
    """Generation-aware VMEM capacity (fallback: v7x per-TC 64 MiB)."""
    try:
        cap = getattr(pltpu.get_tpu_info(), "vmem_capacity_bytes", None)
        if cap:
            return int(cap)
    except Exception:
        pass
    return 64 << 20


def _maybe_single_buffered_spec(block_shape, index_map, single_buffer):
    """BlockSpec; single-buffered (Buffered(1)) when requested and supported."""
    if single_buffer and hasattr(pl, "Buffered"):
        try:
            return pl.BlockSpec(block_shape, index_map,
                                pipeline_mode=pl.Buffered(1))
        except Exception:
            pass
    return pl.BlockSpec(block_shape, index_map)


def highway_kernel(x_ref, w_ref, b_ref, o_ref, *, tail_dtype, n_col_tiles):
    """x_ref: (tb, E_pad); w_ref: (E_pad, 2*tn) [proj|gate] for this column tile;
    b_ref: (1, 2*tn) f32; o_ref: (tb, tn)."""
    tn = o_ref.shape[-1]
    x = x_ref[...]                                  # keep matmul operand in input dtype

    # Canonical (M,K) x (K,N) MXU feed; accumulate in f32.
    pre = jnp.dot(x, w_ref[...], preferred_element_type=jnp.float32) + b_ref[...]
    pre = pre.astype(tail_dtype)

    # Lane-aligned split (tn is a multiple of 128).
    x_proj = jnp.maximum(pre[:, :tn], 0.0)                          # relu (VPU)
    # sigmoid(z) = 0.5 + 0.5*tanh(z/2): single EUP push, exact.
    x_gate = 0.5 * jnp.tanh(0.5 * pre[:, tn:]) + 0.5

    if n_col_tiles == 1:
        x_res = x.astype(tail_dtype)
    else:
        # Residual slice of x matching this output-column tile (128-aligned).
        col0 = pl.multiple_of(pl.program_id(1) * tn, tn)
        x_res = x_ref[:, pl.ds(col0, tn)].astype(tail_dtype)

    # gate*proj + (1-gate)*x  ==  x + gate*(proj - x)   (fewer VALU ops)
    o_ref[...] = (x_res + x_gate * (x_proj - x_res)).astype(o_ref.dtype)


def highway_forward(x, w_proj, b_proj, w_gate, b_gate, *, block_b=None, block_n=None):
    """x: (B, E); w_*: (E, E) PyTorch (out, in) convention; b_*: (E,)."""
    B, E = x.shape
    in_dtype = x.dtype
    itemsize = jnp.dtype(in_dtype).itemsize

    # ---- one-time parameter prep (precomputed in a real model, not per call) ----
    E_pad = _round_up(E, 128)
    pad_e = E_pad - E
    # (out, in) -> (K=in, N=out) layout, zero-padded to lane-aligned E_pad.
    wp_t = jnp.pad(w_proj.T, ((0, pad_e), (0, pad_e))).astype(in_dtype)   # (E_pad, E_pad)
    wg_t = jnp.pad(w_gate.T, ((0, pad_e), (0, pad_e))).astype(in_dtype)
    bp = jnp.pad(b_proj, (0, pad_e)).astype(jnp.float32)
    bg = jnp.pad(b_gate, (0, pad_e)).astype(jnp.float32)
    x_pad = jnp.pad(x, ((0, 0), (0, pad_e))) if pad_e else x

    # ---- generation-aware tile sizing ----
    budget = int(0.75 * _vmem_capacity_bytes())
    sub = 16 if itemsize == 2 else 8

    if block_b is None:
        # ~4 MiB of double-buffered x tiles amortizes the ~0.35us per-step overhead.
        tb = (4 << 20) // max(1, E_pad * itemsize * 4)
        tb = max(sub, min(1024, (tb // sub) * sub))
    else:
        tb = max(sub, (block_b // sub) * sub)
    tb = min(tb, _round_up(B, sub))
    if B >= 2 * sub:
        # v7x megacore: make sure the "parallel" batch axis has >= 2 steps.
        tb = min(tb, _round_up(-(-B // 2), sub))

    def est_bytes(tn, nj):
        x_b = 2 * tb * E_pad * itemsize                       # x, double-buffered
        o_b = 2 * tb * tn * itemsize                          # out, double-buffered
        w_b = (1 if nj == 1 else 2) * E_pad * 2 * tn * itemsize
        b_b = 2 * 2 * tn * 4
        tmp_b = 3 * tb * 2 * tn * 4                           # f32 pre-activation + temps
        return x_b + o_b + w_b + b_b + tmp_b

    m = E_pad // 128
    if block_n is None:
        # Largest lane-aligned column tile (per half) that fits the VMEM budget.
        # (Multiples of 256 preferred for the v6e/v7x 256-wide MXU; the largest
        #  fitting candidate is one whenever E_pad allows.)
        cands = [128 * t for t in range(m, 0, -1) if m % t == 0]
        tn = next((c for c in cands if est_bytes(c, E_pad // c) <= budget), 128)
    else:
        tn = block_n
    nj = E_pad // tn
    nb = -(-B // tb)

    # Fused, per-tile-interleaved weight: tile j holds [proj_j | gate_j],
    # each tn columns wide, so one (E_pad, 2*tn) block per grid step.
    w_fused = jnp.stack(
        [wp_t.reshape(E_pad, nj, tn), wg_t.reshape(E_pad, nj, tn)], axis=2
    ).reshape(E_pad, 2 * E_pad)
    b_fused = jnp.stack(
        [bp.reshape(nj, tn), bg.reshape(nj, tn)], axis=1
    ).reshape(1, 2 * E_pad)

    # Elementwise tail dtype: bf16 I/O -> bf16 tail (v6e/v7x), else f32.
    # TODO(synk): force f32 tail on v5e (no bf16 VPU/EUP) via chip detection.
    tail_dtype = jnp.bfloat16 if in_dtype == jnp.bfloat16 else jnp.float32

    # Resident (constant-index) params get single buffering only when large,
    # so the small-shape path never depends on pipeline_mode support.
    w_block_bytes = E_pad * 2 * tn * itemsize
    single_buffer_params = (nj == 1) and (w_block_bytes > (2 << 20))
    w_spec = _maybe_single_buffered_spec((E_pad, 2 * tn), lambda i, j: (0, j),
                                         single_buffer_params)
    b_spec = _maybe_single_buffered_spec((1, 2 * tn), lambda i, j: (0, j),
                                         single_buffer_params)

    est = est_bytes(tn, nj)
    vmem_limit = None
    if est > (16 << 20):
        vmem_limit = min(max(int(est * 1.5), 32 << 20), budget)

    kernel = functools.partial(highway_kernel, tail_dtype=tail_dtype, n_col_tiles=nj)

    out_padded = pl.pallas_call(
        kernel,
        out_shape=jax.ShapeDtypeStruct((B, E_pad), in_dtype),
        grid=(nb, nj),
        in_specs=[
            pl.BlockSpec((tb, E_pad), lambda i, j: (i, 0)),   # x batch tile (full K)
            w_spec,                                           # fused weight column tile
            b_spec,                                           # fused bias column tile
        ],
        out_specs=pl.BlockSpec((tb, tn), lambda i, j: (i, j)),
        compiler_params=pltpu.CompilerParams(
            dimension_semantics=("parallel", "parallel"),
            vmem_limit_bytes=vmem_limit,
        ),
    )(x_pad, w_fused, b_fused)

    return out_padded[:, :E] if pad_e else out_padded


def highway_reference(x, w_proj, b_proj, w_gate, b_gate):
    hp = lax.Precision.HIGHEST
    x_proj = jax.nn.relu(jnp.dot(x, w_proj.T, precision=hp) + b_proj)
    x_gate = jax.nn.sigmoid(jnp.dot(x, w_gate.T, precision=hp) + b_gate)
    return x_gate * x_proj + (1.0 - x_gate) * x


if __name__ == "__main__":
    # Small shapes consistent with the module: batch=8, word_embedding_size=32.
    B, E = 8, 32
    key = jax.random.PRNGKey(0)
    kx, kwp, kbp, kwg, kbg = jax.random.split(key, 5)

    x = jax.random.normal(kx, (B, E), dtype=jnp.float32)
    # Deterministic synthetic parameters (nn.Linear(E, E) shapes: W=(E,E), b=(E,)).
    bound = 1.0 / (E ** 0.5)
    w_proj = jax.random.uniform(kwp, (E, E), minval=-bound, maxval=bound, dtype=jnp.float32)
    b_proj = jax.random.uniform(kbp, (E,), minval=-bound, maxval=bound, dtype=jnp.float32)
    w_gate = jax.random.uniform(kwg, (E, E), minval=-bound, maxval=bound, dtype=jnp.float32)
    b_gate = jax.random.uniform(kbg, (E,), minval=-bound, maxval=bound, dtype=jnp.float32)

    out = highway_forward(x, w_proj, b_proj, w_gate, b_gate)
    out = jax.block_until_ready(out)

    ref = highway_reference(x, w_proj, b_proj, w_gate, b_gate)
    assert out.shape == (B, E)
    assert jnp.allclose(out, ref, atol=2e-3, rtol=2e-3), "Pallas kernel mismatch vs reference"

    print("KERNEL_OK")
</pallas_src>

<mosaic_0001>
module attributes {stable_mosaic.version = 11 : i64} {
  func.func @highway_kernel(%arg0: i32, %arg1: i32, %arg2: memref<8x128xf32, #tpu.memory_space<vmem>>, %arg3: memref<128x256xf32, #tpu.memory_space<vmem>>, %arg4: memref<1x256xf32, #tpu.memory_space<vmem>>, %arg5: memref<8x128xf32, #tpu.memory_space<vmem>>) attributes {dimension_semantics = [#tpu.dimension_semantics<parallel>, #tpu.dimension_semantics<parallel>], iteration_bounds = array<i64: 1, 1>, scalar_prefetch = 0 : i64, scratch_operands = 0 : i64, tpu.core_type = #tpu.core_type<tc>, window_params = [{transform_indices = @transform_0, window_bounds = array<i64: 8, 128>}, {transform_indices = @transform_1, window_bounds = array<i64: 128, 256>}, {transform_indices = @transform_2, window_bounds = array<i64: 1, 256>}, {transform_indices = @transform_3, window_bounds = array<i64: 8, 128>}]} {
    %c0 = arith.constant 0 : index
    %c0_0 = arith.constant 0 : index
    %0 = vector.load %arg2[%c0, %c0_0] : memref<8x128xf32, #tpu.memory_space<vmem>>, vector<8x128xf32>
    %c0_1 = arith.constant 0 : index
    %c0_2 = arith.constant 0 : index
    %1 = vector.load %arg3[%c0_1, %c0_2] : memref<128x256xf32, #tpu.memory_space<vmem>>, vector<128x256xf32>
    %cst = arith.constant dense<0.000000e+00> : vector<8x256xf32>
    %2 = tpu.matmul %0, %1, %cst {dimension_numbers = #tpu.dot_dimension_numbers<[1], [0], [0], [1], [0, 0, 1, 1], [], []>} : vector<8x128xf32>, vector<128x256xf32>, vector<8x256xf32> -> vector<8x256xf32>
    %c0_3 = arith.constant 0 : index
    %c0_4 = arith.constant 0 : index
    %3 = vector.load %arg4[%c0_3, %c0_4] : memref<1x256xf32, #tpu.memory_space<vmem>>, vector<1x256xf32>
    %4 = vector.broadcast %3 : vector<1x256xf32> to vector<8x256xf32>
    %5 = arith.addf %2, %4 : vector<8x256xf32>
    %6 = vector.extract_strided_slice %5 {offsets = [0, 0], sizes = [8, 128], strides = [1, 1]} : vector<8x256xf32> to vector<8x128xf32>
    %cst_5 = arith.constant 0.000000e+00 : f32
    %7 = vector.broadcast %cst_5 : f32 to vector<8x128xf32>
    %8 = arith.maximumf %6, %7 : vector<8x128xf32>
    %9 = vector.extract_strided_slice %5 {offsets = [0, 128], sizes = [8, 128], strides = [1, 1]} : vector<8x256xf32> to vector<8x128xf32>
    %cst_6 = arith.constant 5.000000e-01 : f32
    %10 = vector.broadcast %cst_6 : f32 to vector<8x128xf32>
    %11 = arith.mulf %10, %9 : vector<8x128xf32>
    %12 = math.tanh %11 : vector<8x128xf32>
    %cst_7 = arith.constant 5.000000e-01 : f32
    %13 = vector.broadcast %cst_7 : f32 to vector<8x128xf32>
    %14 = arith.mulf %13, %12 : vector<8x128xf32>
    %cst_8 = arith.constant 5.000000e-01 : f32
    %15 = vector.broadcast %cst_8 : f32 to vector<8x128xf32>
    %16 = arith.addf %14, %15 : vector<8x128xf32>
    %17 = arith.subf %8, %0 : vector<8x128xf32>
    %18 = arith.mulf %16, %17 : vector<8x128xf32>
    %19 = arith.addf %0, %18 : vector<8x128xf32>
    %c0_9 = arith.constant 0 : index
    %c0_10 = arith.constant 0 : index
    %20 = vector.load %arg5[%c0_9, %c0_10] : memref<8x128xf32, #tpu.memory_space<vmem>>, vector<8x128xf32>
    tpu.vector_store %arg5[%c0_9, %c0_10], %19 {strides = array<i32>} : memref<8x128xf32, #tpu.memory_space<vmem>>, vector<8x128xf32>,
    return
  }
  func.func @transform_0(%arg0: i32, %arg1: i32) -> (i32, i32) {
    %c0_i32 = arith.constant 0 : i32
    %c0_i32_0 = arith.constant 0 : i32
    return %arg0, %c0_i32 : i32, i32
  }
  func.func @transform_1(%arg0: i32, %arg1: i32) -> (i32, i32) {
    %c0_i32 = arith.constant 0 : i32
    %c0_i32_0 = arith.constant 0 : i32
    return %c0_i32, %arg1 : i32, i32
  }
  func.func @transform_2(%arg0: i32, %arg1: i32) -> (i32, i32) {
    %c0_i32 = arith.constant 0 : i32
    %c0_i32_0 = arith.constant 0 : i32
    return %c0_i32, %arg1 : i32, i32
  }
  func.func @transform_3(%arg0: i32, %arg1: i32) -> (i32, i32) {
    %c0_i32 = arith.constant 0 : i32
    return %arg0, %arg1 : i32, i32
  }
}

</mosaic_0001>

<bundles_post_ra>
// kernel: tpu_custom_call.1
= control target key start
LH: loop header
LB: loop body
LE: loop exit
PB: predicated region body
PF: predicated region fallthrough
CT: control target
= control target key end

     0   :  { %8 = vsyncpa [#allocation3], 0  ;;  %s312_s0 = inlined_call_operand.hbm [shape: f32[8,128], index: 0, kind: input, shape index: {}]   ;;  %s313_s1 = inlined_call_operand.hbm [shape: f32[128,256], index: 1, kind: input, shape index: {}]   ;;  %s314_s2 = inlined_call_operand.hbm [shape: f32[1,256], index: 2, kind: input, shape index: {}]   ;;  %s315_s3 = inlined_call_operand.hbm [shape: f32[8,128], index: 3, kind: output, shape index: {}]  }
   0x1   :  { %9 = vsyncpa [#allocation6], 0  ;;  %s26_s14 = sshll.u32 %s313_s1, 4  ;;  %s27_s14 = int_to_ptr.hbm [resolvable:$true] %s26_s14 }
   0x2   :  { %10 = vsyncpa [#allocation4], 0  ;;  %s274_s15 = smov [#allocation5]   ;;  %s16_s19 = sshll.u32 %s312_s0, 4  ;;  %s17_s19 = int_to_ptr.hbm [resolvable:$true] %s16_s19 }
   0x3   :  { %s28_s16 = sshll.u32 %s274_s15, 4  ;;  %s275_s20 = smov 256   ;;  %s29_s16 = int_to_ptr.vmem [resolvable:$true] %s28_s16 }
   0x4   :  { %s276_s21 = smov 16   ;;  %s277_s22 = smov [#allocation2]  }
   0x5   :  { %34 = dma.hbm_to_vmem [thread:$0]  %s27_s14, 4096, %s29_s16, [#allocation6], %s275_s20, %s275_s20, %s276_s21  }
   0x6   :  { %s18_s23 = sshll.u32 %s277_s22, 4  ;;  %s40_s26 = sshll.u32 %s314_s2, 4  ;;  %s19_s23 = int_to_ptr.vmem [resolvable:$true] %s18_s23  ;;  %s41_s26 = int_to_ptr.hbm [resolvable:$true] %s40_s26 }
   0x7   :  { %21 = dma.hbm_to_vmem [thread:$0]  %s17_s19, 128, %s19_s23, [#allocation3]  }
   0x8   :  { %s278_s1 = smov [#allocation7]  }
   0x9   :  { %s42_s27 = sshll.u32 %s278_s1, 4  ;;  %s43_s27 = int_to_ptr.vmem [resolvable:$true] %s42_s27 }
   0xa   :  { %45 = dma.hbm_to_vmem [thread:$0]  %s41_s26, 32, %s43_s27, [#allocation6]  }
   0xb   :  { %268 = dma.done.wait [#allocation3], 128  }
   0xc   :  { %269 = vsyncadd [#allocation3], 4294967168 }
   0xd   :  { %270 = dma.done.wait [#allocation6], 4128  }
   0xe   :  { %271 = vsyncadd [#allocation6], 4294963168  ;;  %v90_v0 = vld [vmem:[#allocation5 + $0xf8] sm:$0xff]  ;;  %v88_v1 = vld [vmem:[#allocation5 + $0xe8] sm:$0xff]  ;;  %s279_s0 = smov [#allocation8]   ;;  %s153_s30 = sshll.u32 %s315_s3, 4  ;;  %s154_s30 = int_to_ptr.hbm [resolvable:$true] %s153_s30 }
   0xf   :  { %117 = vmatpush.msra.mxu1 %v90_v0  ;;  %v89_v2 = vld [vmem:[#allocation5 + $0xf0] sm:$0xff]  ;;  %v86_v3 = vld [vmem:[#allocation5 + $0xd8] sm:$0xff]  ;;  %v87_v4 = vld [vmem:[#allocation5 + $0xe0] sm:$0xff]  ;;  %s151_s2 = sshll.u32 %s279_s0, 4  ;;  %s152_s2 = int_to_ptr.vmem [resolvable:$true] %s151_s2 }
  0x10   :  { %97 = vmatpush.msra.mxu0 %v89_v2  ;;  %v85_v5 = vld [vmem:[#allocation5 + $0xd0] sm:$0xff]  ;;  %v84_v6 = vld [vmem:[#allocation5 + $0xc8] sm:$0xff]  ;;  %v83_v7 = vld [vmem:[#allocation5 + $0xc0] sm:$0xff] }
  0x11   :  { %118 = vmatpush.msra.mxu1 %v88_v1  ;;  %v82_v8 = vld [vmem:[#allocation5 + $0xb8] sm:$0xff]  ;;  %v81_v9 = vld [vmem:[#allocation5 + $0xb0] sm:$0xff]  ;;  %v80_v10 = vld [vmem:[#allocation5 + $0xa8] sm:$0xff] }
  0x12   :  { %98 = vmatpush.msra.mxu0 %v87_v4  ;;  %v79_v11 = vld [vmem:[#allocation5 + $0xa0] sm:$0xff]  ;;  %v78_v12 = vld [vmem:[#allocation5 + $0x98] sm:$0xff]  ;;  %v77_v13 = vld [vmem:[#allocation5 + $0x90] sm:$0xff] }
  0x13   :  { %119 = vmatpush.msra.mxu1 %v86_v3  ;;  %v76_v14 = vld [vmem:[#allocation5 + $0x88] sm:$0xff]  ;;  %v75_v15 = vld [vmem:[#allocation5 + $0x80] sm:$0xff]  ;;  %v74_v16 = vld [vmem:[#allocation5 + $0x78] sm:$0xff] }
  0x14   :  { %99 = vmatpush.msra.mxu0 %v85_v5  ;;  %v73_v17 = vld [vmem:[#allocation5 + $0x70] sm:$0xff]  ;;  %v72_v18 = vld [vmem:[#allocation5 + $0x68] sm:$0xff]  ;;  %v71_v19 = vld [vmem:[#allocation5 + $0x60] sm:$0xff] }
  0x15   :  { %120 = vmatpush.msra.mxu1 %v84_v6  ;;  %v70_v20 = vld [vmem:[#allocation5 + $0x58] sm:$0xff]  ;;  %v69_v21 = vld [vmem:[#allocation5 + $0x50] sm:$0xff]  ;;  %v68_v22 = vld [vmem:[#allocation5 + $0x48] sm:$0xff] }
  0x16   :  { %100 = vmatpush.msra.mxu0 %v83_v7  ;;  %v67_v23 = vld [vmem:[#allocation5 + $0x40] sm:$0xff]  ;;  %v66_v24 = vld [vmem:[#allocation5 + $0x38] sm:$0xff]  ;;  %v65_v25 = vld [vmem:[#allocation5 + $0x30] sm:$0xff] }
  0x17   :  { %121 = vmatpush.msra.mxu1 %v82_v8  ;;  %v64_v26 = vld [vmem:[#allocation5 + $0x28] sm:$0xff]  ;;  %v63_v27 = vld [vmem:[#allocation5 + $0x20] sm:$0xff]  ;;  %v62_v28 = vld [vmem:[#allocation5 + $0x18] sm:$0xff] }
  0x18   :  { %101 = vmatpush.msra.mxu0 %v81_v9  ;;  %v61_v29 = vld [vmem:[#allocation5 + $0x10] sm:$0xff]  ;;  %v60_v30 = vld [vmem:[#allocation5 + $0x8] sm:$0xff]  ;;  %v58_v31 = vld [vmem:[#allocation2] sm:$0xff] }
  0x19   :  { %122 = vmatpush.msra.mxu1 %v80_v10  ;;  %v59_v32 = vld [vmem:[#allocation5] sm:$0xff] }
  0x1a   :  { %102 = vmatpush.msra.mxu0 %v79_v11  ;;  %v91_v33 = vld [vmem:[#allocation7] sm:$0x3] }
  0x1b   :  { %123 = vmatpush.msra.mxu1 %v78_v12  ;;  %v94_v34 = vperm.slane %v91_v33, 1  ;;  %v93_v36 = vperm.slane %v91_v33, 0 }
  0x1c   :  { %103 = vmatpush.msra.mxu0 %v77_v13 }
  0x1d   :  { %124 = vmatpush.msra.mxu1 %v76_v14 }
  0x1e   :  { %104 = vmatpush.msra.mxu0 %v75_v15 }
  0x1f   :  { %125 = vmatpush.msra.mxu1 %v74_v16 }
  0x20   :  { %105 = vmatpush.msra.mxu0 %v73_v17 }
  0x21   :  { %126 = vmatpush.msra.mxu1 %v72_v18 }
  0x22   :  { %106 = vmatpush.msra.mxu0 %v71_v19 }
  0x23   :  { %127 = vmatpush.msra.mxu1 %v70_v20 }
  0x24   :  { %107 = vmatpush.msra.mxu0 %v69_v21 }
  0x25   :  { %128 = vmatpush.msra.mxu1 %v68_v22 }
  0x26   :  { %108 = vmatpush.msra.mxu0 %v67_v23 }
  0x27   :  { %129 = vmatpush.msra.mxu1 %v66_v24 }
  0x28   :  { %109 = vmatpush.msra.mxu0 %v65_v25 }
  0x29   :  { %130 = vmatpush.msra.mxu1 %v64_v26 }
  0x2a   :  { %110 = vmatpush.msra.mxu0 %v63_v27 }
  0x2b   :  { %131 = vmatpush.msra.mxu1 %v62_v28 }
  0x2c   :  { %111 = vmatpush.msra.mxu0 %v61_v29 }
  0x2d   :  { %132 = vmatpush.msra.mxu1 %v60_v30 }
  0x2e   :  { %133 = vmatmul.f32.vlgmr.msra.gmra.mxu1 %v58_v31  ;;  %112 = vmatpush.msra.mxu0 %v59_v32 }
  0x2f   :  { %113 = vmatmul.f32.vlgmr.msra.gmra.mxu0 %v58_v31 }
  0xab   :  { %v134_v35 = vpop.f32.mrf.mxu1 }
  0xac   :  { %v135_v37 = vadd.f32 %v134_v35, %v94_v34  ;;  %v114_v38 = vpop.f32.mrf.mxu0 }
  0xad   :  { %v115_v40 = vadd.f32 %v114_v38, %v93_v36 }
  0xae   :  { %v138_v39 = vmul.f32 0.5, %v135_v37 }
  0xaf   :  { %v137_v41 = vmax.f32 %v115_v40, 0.0 }
  0xb0   :  { %170 = vtanh.f32 %v138_v39 }
  0xb1   :  { %v142_v44 = vsub.f32 %v137_v41, %v58_v31 }
  0xb6   :  { %v171_v42 = vpop.eup %170 }
  0xb7   :  { %v140_v43 = vmul.f32 0.5, %v171_v42 }
  0xb9   :  { %v141_v45 = vadd.f32 0.5, %v140_v43 }
  0xbb   :  { %v143_v46 = vmul.f32 %v142_v44, %v141_v45 }
  0xbd   :  { %v144_v47 = vadd.f32 %v143_v46, %v58_v31 }
  0xbf   :  { %145 = vst [vmem:[#allocation8] sm:$0xff] %v144_v47 }
  0xc0   :  { %156 = dma.vmem_to_hbm [thread:$0]  %s152_s2, 128, %s154_s30, [#allocation4]  }
  0xc1   :  { %272 = dma.done.wait [#allocation4], 128  }
  0xc2   :  { %273 = vsyncadd [#allocation4], 4294967168 }
  0xc3   :  { %161 = vsyncpa [#allocation3], 1 }
  0xc4   :  { %162 = vsyncpa [#allocation6], 1 }
  0xc5   :  { %163 = vsyncpa [#allocation4], 1 }

</bundles_post_ra>
